<compile_context>
chip_gen: v5e
topology: v5e:2x2
jax: 0.10.0
libtpu: 0.0.40
codegen_flags: <defaults>
</compile_context>

<pallas_src>
import jax
import jax.numpy as jnp
from jax.experimental import pallas as pl
from jax.experimental.pallas import tpu as pltpu


def _rmsnorm_kernel(x_ref, g_ref, o_ref):
    # x_ref block: (1, C, T)  ->  view (C, T); channels on sublanes, pixels on lanes.
    x = x_ref[0].astype(jnp.float32)                      # (C, T)
    ss = jnp.sum(x * x, axis=0, keepdims=True)            # (1, T)  cross-sublane reduce (XLU)
    # F.normalize semantics: x / max(||x||, 1e-12)  ==  x * rsqrt(max(ss, 1e-24))
    inv = jax.lax.rsqrt(jnp.maximum(ss, 1e-24))           # EUP rsqrt, no divide
    y = x * inv * g_ref[...]                              # g_ref: (C, 1), sqrt(C) pre-folded
    o_ref[0] = y.astype(o_ref.dtype)


def rmsnorm(x, g, *, tile_hw=2048):
    """RMSNorm over the channel axis of an NCHW tensor.

    x: (B, C, H, W)   g: (C,) or any shape with C elements (e.g. (1, C, 1, 1)).
    Returns F.normalize(x, dim=1) * g * sqrt(C), same dtype as x.
    """
    B, C, H, W = x.shape
    HW = H * W
    x3 = x.reshape(B, C, HW)

    # Fold the * sqrt(C) factor into g; keep params in f32.
    g2 = (g.reshape(C, 1).astype(jnp.float32)) * (float(C) ** 0.5)

    # Lane tile over H*W: full extent if small, otherwise a multiple of 128 and
    # let Pallas handle the ragged edge block (no host-side padding).
    T = HW if HW <= tile_hw else tile_hw
    grid = (B, pl.cdiv(HW, T))

    out = pl.pallas_call(
        _rmsnorm_kernel,
        out_shape=jax.ShapeDtypeStruct((B, C, HW), x.dtype),
        grid=grid,
        in_specs=[
            pl.BlockSpec((1, C, T), lambda b, j: (b, 0, j)),
            pl.BlockSpec((C, 1), lambda b, j: (0, 0)),
        ],
        out_specs=pl.BlockSpec((1, C, T), lambda b, j: (b, 0, j)),
        compiler_params=pltpu.CompilerParams(
            dimension_semantics=("parallel", "parallel"),
            vmem_limit_bytes=32 * 1024 * 1024,
        ),
    )(x3, g2)
    return out.reshape(B, C, H, W)


def _rmsnorm_reference(x, g):
    """Pure-JAX reference matching F.normalize(x, dim=1) * g * sqrt(C)."""
    B, C, H, W = x.shape
    xf = x.astype(jnp.float32)
    n = jnp.sqrt(jnp.sum(xf * xf, axis=1, keepdims=True))
    y = xf / jnp.maximum(n, 1e-12)
    return (y * g.reshape(1, C, 1, 1).astype(jnp.float32) * (float(C) ** 0.5)).astype(x.dtype)


if __name__ == "__main__":
    B, C, H, W = 2, 32, 16, 16

    key = jax.random.PRNGKey(0)
    kx, kg = jax.random.split(key)
    x = jax.random.normal(kx, (B, C, H, W), jnp.float32)
    # g is nn.Parameter(torch.ones(1, dim, 1, 1)); perturb a bit for a non-trivial check.
    g = jnp.ones((1, C, 1, 1), jnp.float32) + 0.05 * jax.random.normal(kg, (1, C, 1, 1), jnp.float32)

    fwd = jax.jit(rmsnorm)
    out = jax.block_until_ready(fwd(x, g))

    ref = _rmsnorm_reference(x, g)
    assert out.shape == (B, C, H, W), out.shape
    assert bool(jnp.all(jnp.isfinite(out)))
    assert bool(jnp.allclose(out, ref, atol=1e-5, rtol=1e-5)), float(jnp.max(jnp.abs(out - ref)))
    print("KERNEL_OK")
</pallas_src>

<mosaic_0001>
module attributes {stable_mosaic.version = 11 : i64} {
  func.func @_rmsnorm_kernel(%arg0: i32, %arg1: i32, %arg2: memref<1x32x256xf32, #tpu.memory_space<vmem>>, %arg3: memref<32x1xf32, #tpu.memory_space<vmem>>, %arg4: memref<1x32x256xf32, #tpu.memory_space<vmem>>) attributes {dimension_semantics = [#tpu.dimension_semantics<parallel>, #tpu.dimension_semantics<parallel>], iteration_bounds = array<i64: 2, 1>, scalar_prefetch = 0 : i64, scratch_operands = 0 : i64, tpu.core_type = #tpu.core_type<tc>, window_params = [{transform_indices = @transform_0, window_bounds = array<i64: 1, 32, 256>}, {pipeline_mode = #tpu.pipeline_mode<synchronous>, transform_indices = @transform_1, window_bounds = array<i64: 32, 1>}, {transform_indices = @transform_2, window_bounds = array<i64: 1, 32, 256>}]} {
    %c0 = arith.constant 0 : index
    %c0_0 = arith.constant 0 : index
    %c0_1 = arith.constant 0 : index
    %0 = vector.load %arg2[%c0, %c0_0, %c0_1] : memref<1x32x256xf32, #tpu.memory_space<vmem>>, vector<1x32x256xf32>
    %1 = vector.shape_cast %0 : vector<1x32x256xf32> to vector<32x256xf32>
    %2 = arith.mulf %1, %1 : vector<32x256xf32>
    %cst = arith.constant dense<0.000000e+00> : vector<256xf32>
    %3 = vector.multi_reduction <add>, %2, %cst [0] : vector<32x256xf32> to vector<256xf32>
    %4 = vector.shape_cast %3 : vector<256xf32> to vector<1x256xf32>
    %cst_2 = arith.constant 1.000000e-24 : f32
    %5 = vector.broadcast %cst_2 : f32 to vector<1x256xf32>
    %6 = arith.maximumf %4, %5 : vector<1x256xf32>
    %7 = math.rsqrt %6 : vector<1x256xf32>
    %8 = vector.broadcast %7 : vector<1x256xf32> to vector<32x256xf32>
    %9 = arith.mulf %1, %8 : vector<32x256xf32>
    %c0_3 = arith.constant 0 : index
    %c0_4 = arith.constant 0 : index
    %10 = vector.load %arg3[%c0_3, %c0_4] : memref<32x1xf32, #tpu.memory_space<vmem>>, vector<32x1xf32>
    %11 = vector.broadcast %10 : vector<32x1xf32> to vector<32x256xf32>
    %12 = arith.mulf %9, %11 : vector<32x256xf32>
    %c0_5 = arith.constant 0 : index
    %c0_6 = arith.constant 0 : index
    %c0_7 = arith.constant 0 : index
    %13 = vector.load %arg4[%c0_5, %c0_6, %c0_7] : memref<1x32x256xf32, #tpu.memory_space<vmem>>, vector<1x32x256xf32>
    %14 = vector.shape_cast %13 : vector<1x32x256xf32> to vector<32x256xf32>
    %15 = vector.shape_cast %12 : vector<32x256xf32> to vector<1x32x256xf32>
    tpu.vector_store %arg4[%c0_5, %c0_6, %c0_7], %15 {strides = array<i32>} : memref<1x32x256xf32, #tpu.memory_space<vmem>>, vector<1x32x256xf32>,
    return
  }
  func.func @transform_0(%arg0: i32, %arg1: i32) -> (i32, i32, i32) {
    %c0_i32 = arith.constant 0 : i32
    %c0_i32_0 = arith.constant 0 : i32
    return %arg0, %c0_i32, %arg1 : i32, i32, i32
  }
  func.func @transform_1(%arg0: i32, %arg1: i32) -> (i32, i32) {
    %c0_i32 = arith.constant 0 : i32
    %c0_i32_0 = arith.constant 0 : i32
    %c0_i32_1 = arith.constant 0 : i32
    return %c0_i32, %c0_i32_0 : i32, i32
  }
  func.func @transform_2(%arg0: i32, %arg1: i32) -> (i32, i32, i32) {
    %c0_i32 = arith.constant 0 : i32
    %c0_i32_0 = arith.constant 0 : i32
    return %arg0, %c0_i32, %arg1 : i32, i32, i32
  }
}

</mosaic_0001>

<bundles_post_ra>
// kernel: rmsnorm.1
= control target key start
LH: loop header
LB: loop body
LE: loop exit
PB: predicated region body
PF: predicated region fallthrough
CT: control target
= control target key end

     0   :  { %s458_s9 = smov 0   ;;  %s460_s10 = smov 0   ;;  %s520_s0 = inlined_call_operand.vmem [shape: f32[2,32,256], index: 0, kind: input, shape index: {}]   ;;  %s521_s1 = inlined_call_operand.vmem [shape: f32[32,1], index: 1, kind: input, shape index: {}]   ;;  %s522_s2 = inlined_call_operand.vmem [shape: f32[2,32,256], index: 2, kind: output, shape index: {}]  }
   0x1   :  { %s462_s11 = smov 0  }
   0x2 LB: > { %s24_s12 = sadd.s32 1, %s436_s10  ;;  %p378_p0 = scmp.ge.s32.totalorder %s440_s11, 1  ;;  %s440_s11 = sphi %s462_s11, %s12_s11   ;;  %s436_s10 = sphi %s460_s10, %s524_s10   ;;  %s432_s9 = sphi %s458_s9, %s523_s9  }
   0x3   : > { %p26_p1 = scmp.ge.s32.totalorder %s24_s12, 2  ;;  %p133_p2 = scmp.lt.s32.totalorder %s440_s11, 3 }
   0x5   : > { %s526_s12 = smov (%p26_p1, %s24_s12), 0  ;;  %p134_p3 = pnand %p378_p0, %p133_p2 }
   0x6   : > { %p164_p4 = scmp.lt.s32.totalorder (!%p134_p3), %s432_s9, 1 }
   0x7   : > { %137 = sbr.rel (%p134_p3) target bundleno = 143 (0x8f), region = 28 }
   0xc   : > { %v249_v0 = vld [vmem:[%s521_s1 + $0x10] sm:$0xff]  ;;  %v247_v1 = vld [vmem:[%s521_s1] sm:$0xff]  ;;  %v442_v2 = vmov 0   ;;  %v250_v3 = vld [vmem:[%s521_s1 + $0x18] sm:$0xff]  ;;  %s528_s9 = smov (!%p164_p4, %s432_s9), 1 }
   0xd   : > { %413 = vset.pattern.permute.xlu1 %v442_v2  ;;  %412 = vset.pattern.permute.xlu0 %v442_v2  ;;  %v248_v4 = vld [vmem:[%s521_s1 + $0x8] sm:$0xff]  ;;  %s385_s21 = sshll.u32 %s528_s9, 6 }
   0xe   : > { %263 = vperm.xlu1 %413, %v249_v0   ;;  %253 = vperm.xlu0 %412, %v247_v1   ;;  %s171_s24 = scalar_lea.vmem %s520_s0, %s385_s21  ;;  %s181_s27 = scalar_lea.vmem %s522_s2, %s385_s21 }
   0xf   : > { %v183_v5 = vld [vmem:[%s171_s24] sm:$0xff]  ;;  %v184_v6 = vld [vmem:[%s171_s24 + $0x8] sm:$0xff]  ;;  %v496_v7 = vld [vmem:[%s171_s24 + $0x10] sm:$0xff] }
  0x10   : > { %v498_v8 = vld [vmem:[%s171_s24 + $0x18] sm:$0xff]  ;;  %v191_v9 = vmul.f32 %v183_v5, %v183_v5  ;;  %v192_v10 = vmul.f32 %v184_v6, %v184_v6  ;;  %v193_v11 = vmul.f32 %v496_v7, %v496_v7  ;;  %v187_v12 = vld [vmem:[%s171_s24 + $0x20] sm:$0xff]  ;;  %v188_v13 = vld [vmem:[%s171_s24 + $0x28] sm:$0xff] }
  0x11   : > { %v194_v14 = vmul.f32 %v498_v8, %v498_v8  ;;  %v195_v15 = vmul.f32 %v187_v12, %v187_v12  ;;  %v196_v16 = vmul.f32 %v188_v13, %v188_v13  ;;  %v189_v18 = vld [vmem:[%s171_s24 + $0x30] sm:$0xff]  ;;  %v190_v19 = vld [vmem:[%s171_s24 + $0x38] sm:$0xff] }
  0x12   : > { %v199_v17 = vadd.f32 %v193_v11, %v191_v9  ;;  %v197_v21 = vmul.f32 %v189_v18, %v189_v18  ;;  %v198_v22 = vmul.f32 %v190_v19, %v190_v19 }
  0x13   : > { %v208_v20 = vadd.f32 %v194_v14, %v192_v10 }
  0x14   : > { %v200_v23 = vadd.f32 %v199_v17, %v195_v15 }
  0x15   : > { %v209_v24 = vadd.f32 %v208_v20, %v196_v16 }
  0x16   : > { %268 = vperm.xlu1 %413, %v250_v3   ;;  %258 = vperm.xlu0 %412, %v248_v4   ;;  %v201_v25 = vadd.f32 %v200_v23, %v197_v21 }
  0x17   : > { %v210_v26 = vadd.f32 %v209_v24, %v198_v22 }
  0x18   : > { %v202_v27 = vrot.slane %v201_v25, 4 }
  0x19   : > { %v211_v28 = vrot.slane %v210_v26, 4 }
  0x1a   : > { %v203_v29 = vadd.f32 %v202_v27, %v201_v25 }
  0x1b   : > { %v212_v30 = vadd.f32 %v211_v28, %v210_v26 }
  0x1c   : > { %v204_v31 = vrot.slane %v203_v29, 2 }
  0x1d   : > { %v213_v32 = vrot.slane %v212_v30, 2 }
  0x1e   : > { %v205_v33 = vadd.f32 %v204_v31, %v203_v29 }
  0x1f   : > { %v214_v34 = vadd.f32 %v213_v32, %v212_v30 }
  0x20   : > { %v206_v35 = vrot.slane %v205_v33, 1 }
  0x21   : > { %v215_v36 = vrot.slane %v214_v34, 1 }
  0x22   : > { %v207_v37 = vadd.f32 %v206_v35, %v205_v33 }
  0x23   : > { %v216_v38 = vadd.f32 %v215_v36, %v214_v34 }
  0x24   : > { %v217_v39 = vmax.f32 %v207_v37, 1e-24 }
  0x25   : > { %v218_v40 = vmax.f32 %v216_v38, 1e-24 }
  0x26   : > { %414 = vrsqrt.f32 %v217_v39  ;;  %vm225_vm0 = vweird.f32 %v217_v39 }
  0x27   : > { %416 = vrsqrt.f32 %v218_v40  ;;  %vm235_vm2 = vweird.f32 %v218_v40 }
  0x2c   : > { %v415_v41 = vpop.eup %414 }
  0x2d   : > { %v417_v42 = vpop.eup %416  ;;  %v220_v43 = vmul.f32 %v415_v41, %v217_v39  ;;  %vm226_vm1 = vweird.f32 %v415_v41 }
  0x2e   : > { %v230_v44 = vmul.f32 %v417_v42, %v218_v40  ;;  %vm236_vm3 = vweird.f32 %v417_v42  ;;  %vm227_vm4 = vmor %vm225_vm0, %vm226_vm1 }
  0x2f   : > { %v221_v45 = vmul.f32 %v415_v41, %v220_v43  ;;  %vm237_vm5 = vmor %vm235_vm2, %vm236_vm3 }
  0x30   : > { %v231_v46 = vmul.f32 %v417_v42, %v230_v44 }
  0x31   : > { %v222_v47 = vmul.f32 0.5, %v221_v45 }
  0x32   : > { %v232_v48 = vmul.f32 0.5, %v231_v46 }
  0x33   : > { %v223_v49 = vsub.f32 1.5, %v222_v47 }
  0x34   : > { %v233_v50 = vsub.f32 1.5, %v232_v48 }
  0x35   : > { %v224_v51 = vmul.f32 %v415_v41, %v223_v49 }
  0x36   : > { %v234_v52 = vmul.f32 %v417_v42, %v233_v50 }
  0x37   : > { %v228_v53 = vsel %vm227_vm4, %v415_v41, %v224_v51 }
  0x38   : > { %v238_v54 = vsel %vm237_vm5, %v417_v42, %v234_v52  ;;  %v243_v55 = vmul.f32 %v228_v53, %v187_v12  ;;  %v239_v57 = vmul.f32 %v228_v53, %v183_v5  ;;  %v245_v1 = vmul.f32 %v228_v53, %v189_v18 }
  0x39   : > { %v244_v56 = vmul.f32 %v238_v54, %v188_v13  ;;  %v240_v58 = vmul.f32 %v238_v54, %v184_v6  ;;  %v246_v2 = vmul.f32 %v238_v54, %v190_v19  ;;  %v241_v3 = vmul.f32 %v228_v53, %v496_v7 }
  0x3a   : > { %v242_v4 = vmul.f32 %v238_v54, %v498_v8 }
  0x80   : > { %v264_v59 = vpop.permute.xlu1 %263  ;;  %v254_v60 = vpop.permute.xlu0 %253 }
  0x81   : > { %v275_v61 = vmul.f32 %v264_v59, %v243_v55  ;;  %v276_v62 = vmul.f32 %v264_v59, %v244_v56  ;;  %v271_v63 = vmul.f32 %v254_v60, %v239_v57  ;;  %v272_v0 = vmul.f32 %v254_v60, %v240_v58 }
  0x83   : > { %283 = vst [vmem:[%s181_s27 + $0x20] sm:$0xff] %v275_v61 }
  0x84   : > { %284 = vst [vmem:[%s181_s27 + $0x28] sm:$0xff] %v276_v62 }
  0x85   : > { %279 = vst [vmem:[%s181_s27] sm:$0xff] %v271_v63 }
  0x86   : > { %280 = vst [vmem:[%s181_s27 + $0x8] sm:$0xff] %v272_v0 }
  0x88   : > { %v269_v5 = vpop.permute.xlu1 %268  ;;  %v259_v6 = vpop.permute.xlu0 %258 }
  0x89   : > { %v277_v9 = vmul.f32 %v269_v5, %v245_v1  ;;  %v278_v10 = vmul.f32 %v269_v5, %v246_v2  ;;  %v273_v11 = vmul.f32 %v259_v6, %v241_v3  ;;  %v274_v12 = vmul.f32 %v259_v6, %v242_v4 }
  0x8b   : > { %285 = vst [vmem:[%s181_s27 + $0x30] sm:$0xff] %v277_v9 }
  0x8c   : > { %286 = vst [vmem:[%s181_s27 + $0x38] sm:$0xff] %v278_v10 }
  0x8d   : > { %281 = vst [vmem:[%s181_s27 + $0x10] sm:$0xff] %v273_v11 }
  0x8e   : > { %282 = vst [vmem:[%s181_s27 + $0x18] sm:$0xff] %v274_v12 }
  0x8f PF: > { %s12_s11 = sadd.s32 1, %s440_s11   ;;  %s523_s9 = smov %s436_s10 }
  0x90   : > { %p9_p5 = scmp.ge.s32.totalorder %s12_s11, 4   ;;  %s524_s10 = smov %s526_s12 }
  0x92   :  { %11 = sbr.rel (!%p9_p5) target bundleno = 2 (0x2), region = 58 }

</bundles_post_ra>
